<compile_context>
chip_gen: v5e
topology: v5e:2x2
jax: 0.10.0
libtpu: 0.0.40
codegen_flags: <defaults>
</compile_context>

<pallas_src>
import functools

import jax
import jax.numpy as jnp
from jax.experimental import pallas as pl
from jax.experimental.pallas import tpu as pltpu


def att_add_kernel(len_ref,      # VMEM (B_blk, 1) int32
                   enc_ref,      # VMEM (B_blk, T, D_enc) f32
                   dec_ref,      # VMEM (B_blk, D_dec)    f32
                   w_enc_ref,    # VMEM (D_enc, att_dim)  bf16
                   b_enc_ref,    # VMEM (1, att_dim)      f32
                   w_dec_ref,    # VMEM (D_dec, att_dim)  f32
                   gvec_w_ref,   # VMEM (1, att_dim)      f32   (row layout)
                   gvec_b_ref,   # VMEM (1, 1)            f32
                   c_ref,        # VMEM (B_blk, D_enc)    f32   output
                   w_ref,        # VMEM (B_blk, T)        f32   output
                   *, scaling):
    B_blk, T, D_enc = enc_ref.shape
    att_dim = w_enc_ref.shape[1]

    enc = enc_ref[...]                                            # (B_blk, T, D_enc) f32

    # --- mlp_enc: the dominant matmul, bf16 operands -> f32 accumulation on the MXU ---
    enc2 = enc.reshape(B_blk * T, D_enc)
    pre2 = jnp.dot(enc2.astype(jnp.bfloat16), w_enc_ref[...],
                   preferred_element_type=jnp.float32)            # (B_blk*T, att_dim)
    pre = pre2.reshape(B_blk, T, att_dim)

    # --- mlp_dec: one small batched matmul per block, encoder bias folded in ---
    dproj = jnp.dot(dec_ref[...], w_dec_ref[...],
                    preferred_element_type=jnp.float32) + b_enc_ref[...]   # (B_blk, att_dim)

    # --- gvec: tanh + VPU multiply + lane reduce (no (.., 1) MXU matmul) ---
    h = jnp.tanh(pre + dproj[:, None, :])                         # (B_blk, T, att_dim)
    e = jnp.sum(h * gvec_w_ref[...], axis=-1) + gvec_b_ref[...]   # (B_blk, T)

    # --- pad mask: positions t >= length -> -inf (lane iota vs per-row length) ---
    t_idx = jax.lax.broadcasted_iota(jnp.int32, (B_blk, T), 1)
    e = jnp.where(t_idx >= len_ref[...], -jnp.inf, e)

    # --- softmax(scaling * e) over T (lane axis) ---
    s = scaling * e
    m = jnp.max(s, axis=-1, keepdims=True)
    p = jnp.exp(s - m)
    w = p / jnp.sum(p, axis=-1, keepdims=True)                    # (B_blk, T)

    # --- context: weighted sum over T (VPU multiply + sublane reduce) ---
    c = jnp.sum(enc * w[:, :, None], axis=1)                      # (B_blk, D_enc)

    w_ref[...] = w
    c_ref[...] = c.astype(c_ref.dtype)


def _round_up(x, m):
    return ((x + m - 1) // m) * m


def att_add_forward(enc_hs_pad, enc_hs_len, dec_z, params, scaling=2.0):
    """Returns (c, w): context (B, D_enc) and attention weights (B, T)."""
    enc_hs_pad = jnp.asarray(enc_hs_pad, jnp.float32)
    dec_z = jnp.asarray(dec_z, jnp.float32)
    B, T, D_enc = enc_hs_pad.shape
    D_dec, att_dim = params["w_dec"].shape

    # Lane-dense padding (last dims multiples of 128); the >= length mask keeps
    # padded time steps at zero weight, padded features are zero.
    T_p = _round_up(T, 128)
    D_enc_p = _round_up(D_enc, 128)
    att_p = _round_up(att_dim, 128)

    # Batch blocking: whole batch in one step if small, otherwise blocks of 8
    # (multiple of the sublane width). On v7x halve B_blk if VMEM gets tight.
    B_blk = B if B <= 8 else 8
    B_p = _round_up(B, B_blk)

    enc_p = jnp.zeros((B_p, T_p, D_enc_p), jnp.float32).at[:B, :T, :D_enc].set(enc_hs_pad)
    dec_p = jnp.zeros((B_p, D_dec), jnp.float32).at[:B].set(dec_z)

    lens = jnp.asarray(enc_hs_len, jnp.int32).reshape(B, 1)
    # Padded batch rows get length 1 so their (discarded) softmax stays finite.
    lens_p = jnp.ones((B_p, 1), jnp.int32).at[:B].set(lens)

    w_enc_p = (jnp.zeros((D_enc_p, att_p), jnp.float32)
               .at[:D_enc, :att_dim].set(jnp.asarray(params["w_enc"], jnp.float32))
               .astype(jnp.bfloat16))                       # bf16 operand for the MXU
    b_enc_p = (jnp.zeros((1, att_p), jnp.float32)
               .at[:, :att_dim].set(jnp.asarray(params["b_enc"], jnp.float32).reshape(1, att_dim)))
    w_dec_p = (jnp.zeros((D_dec, att_p), jnp.float32)
               .at[:, :att_dim].set(jnp.asarray(params["w_dec"], jnp.float32)))
    gvec_w_row = (jnp.zeros((1, att_p), jnp.float32)
                  .at[:, :att_dim].set(jnp.asarray(params["gvec_w"], jnp.float32).reshape(1, att_dim)))
    gvec_b = jnp.asarray(params["gvec_b"], jnp.float32).reshape(1, 1)

    kernel = functools.partial(att_add_kernel, scaling=float(scaling))

    # VMEM budget: batch-varying blocks are double-buffered, invariant weights are not
    # re-DMA'd (constant block index). Add headroom; stays well under v7x's 64 MiB.
    blk_bytes = 4 * (B_blk * T_p * D_enc_p + B_blk * D_dec + B_blk
                     + B_blk * D_enc_p + B_blk * T_p)
    wgt_bytes = 2 * D_enc_p * att_p + 4 * (att_p + D_dec * att_p + att_p + 1)
    vmem_limit = int(min(60 * 2**20, max(16 * 2**20, 4 * blk_bytes + 2 * wgt_bytes)))

    grid_spec = pltpu.PrefetchScalarGridSpec(
        num_scalar_prefetch=0,
        grid=(B_p // B_blk,),
        in_specs=[
            pl.BlockSpec((B_blk, 1), lambda b: (b, 0)),                 # lengths
            pl.BlockSpec((B_blk, T_p, D_enc_p), lambda b: (b, 0, 0)),   # enc
            pl.BlockSpec((B_blk, D_dec), lambda b: (b, 0)),             # dec
            pl.BlockSpec((D_enc_p, att_p), lambda b: (0, 0)),           # w_enc (bf16)
            pl.BlockSpec((1, att_p), lambda b: (0, 0)),                 # b_enc
            pl.BlockSpec((D_dec, att_p), lambda b: (0, 0)),             # w_dec
            pl.BlockSpec((1, att_p), lambda b: (0, 0)),                 # gvec_w (row)
            pl.BlockSpec((1, 1), lambda b: (0, 0)),                     # gvec_b
        ],
        out_specs=[
            pl.BlockSpec((B_blk, D_enc_p), lambda b: (b, 0)),           # c
            pl.BlockSpec((B_blk, T_p), lambda b: (b, 0)),               # w
        ],
    )

    c_p, w_p = pl.pallas_call(
        kernel,
        grid_spec=grid_spec,
        out_shape=(
            jax.ShapeDtypeStruct((B_p, D_enc_p), jnp.float32),
            jax.ShapeDtypeStruct((B_p, T_p), jnp.float32),
        ),
        compiler_params=pltpu.CompilerParams(
            dimension_semantics=("parallel",),
            vmem_limit_bytes=vmem_limit,
        ),
    )(lens_p, enc_p, dec_p, w_enc_p, b_enc_p, w_dec_p, gvec_w_row, gvec_b)

    return c_p[:B, :D_enc], w_p[:B, :T]


def att_add_reference(enc_hs_pad, enc_hs_len, dec_z, params, scaling=2.0):
    """Pure-JAX f32 reference mirroring the PyTorch forward."""
    B, T, _ = enc_hs_pad.shape
    pre = enc_hs_pad @ params["w_enc"] + params["b_enc"]          # (B, T, att_dim)
    dproj = (dec_z @ params["w_dec"])[:, None, :]                 # (B, 1, att_dim)
    e = (jnp.tanh(pre + dproj) @ params["gvec_w"])[..., 0] + params["gvec_b"][0, 0]
    mask = jnp.arange(T)[None, :] >= jnp.asarray(enc_hs_len)[:, None]
    e = jnp.where(mask, -jnp.inf, e)
    w = jax.nn.softmax(scaling * e, axis=1)
    c = jnp.sum(enc_hs_pad * w[:, :, None], axis=1)
    return c, w


if __name__ == "__main__":
    B, T = 2, 8
    eprojs, dunits, att_dim = 16, 32, 32

    key = jax.random.PRNGKey(0)
    k_enc, k_dec, k_we, k_be, k_wd, k_gw, k_gb = jax.random.split(key, 7)

    enc_hs_pad = jax.random.normal(k_enc, (B, T, eprojs), dtype=jnp.float32)
    dec_z = jax.random.normal(k_dec, (B, dunits), dtype=jnp.float32)
    enc_hs_len = [8, 5]

    params = {
        "w_enc": 0.1 * jax.random.normal(k_we, (eprojs, att_dim), dtype=jnp.float32),
        "b_enc": 0.1 * jax.random.normal(k_be, (1, att_dim), dtype=jnp.float32),
        "w_dec": 0.1 * jax.random.normal(k_wd, (dunits, att_dim), dtype=jnp.float32),
        "gvec_w": 0.1 * jax.random.normal(k_gw, (att_dim, 1), dtype=jnp.float32),
        "gvec_b": 0.1 * jax.random.normal(k_gb, (1, 1), dtype=jnp.float32),
    }

    c, w = att_add_forward(enc_hs_pad, enc_hs_len, dec_z, params, scaling=2.0)
    jax.block_until_ready((c, w))

    c_ref, w_ref = att_add_reference(enc_hs_pad, enc_hs_len, dec_z, params, scaling=2.0)
    assert c.shape == (B, eprojs) and w.shape == (B, T)
    # bf16 operands on the enc @ w_enc matmul (f32 accumulation) -> relaxed tolerance.
    assert jnp.allclose(c, c_ref, atol=1e-2, rtol=1e-2), (c, c_ref)
    assert jnp.allclose(w, w_ref, atol=1e-2, rtol=1e-2), (w, w_ref)
    assert bool(jnp.all(jnp.isfinite(c))) and bool(jnp.all(jnp.isfinite(w)))

    print("KERNEL_OK")
</pallas_src>

<mosaic_0001>
module attributes {stable_mosaic.version = 11 : i64} {
  func.func @att_add_kernel(%arg0: i32, %arg1: memref<2x1xi32, #tpu.memory_space<vmem>>, %arg2: memref<2x128x128xf32, #tpu.memory_space<vmem>>, %arg3: memref<2x32xf32, #tpu.memory_space<vmem>>, %arg4: memref<128x128xbf16, #tpu.memory_space<vmem>>, %arg5: memref<1x128xf32, #tpu.memory_space<vmem>>, %arg6: memref<32x128xf32, #tpu.memory_space<vmem>>, %arg7: memref<1x128xf32, #tpu.memory_space<vmem>>, %arg8: memref<1x1xf32, #tpu.memory_space<vmem>>, %arg9: memref<2x128xf32, #tpu.memory_space<vmem>>, %arg10: memref<2x128xf32, #tpu.memory_space<vmem>>) attributes {dimension_semantics = [#tpu.dimension_semantics<parallel>], iteration_bounds = array<i64: 1>, scalar_prefetch = 0 : i64, scratch_operands = 0 : i64, tpu.core_type = #tpu.core_type<tc>, window_params = [{transform_indices = @transform_0, window_bounds = array<i64: 2, 1>}, {transform_indices = @transform_1, window_bounds = array<i64: 2, 128, 128>}, {transform_indices = @transform_2, window_bounds = array<i64: 2, 32>}, {pipeline_mode = #tpu.pipeline_mode<synchronous>, transform_indices = @transform_3, window_bounds = array<i64: 128, 128>}, {pipeline_mode = #tpu.pipeline_mode<synchronous>, transform_indices = @transform_4, window_bounds = array<i64: 1, 128>}, {pipeline_mode = #tpu.pipeline_mode<synchronous>, transform_indices = @transform_5, window_bounds = array<i64: 32, 128>}, {pipeline_mode = #tpu.pipeline_mode<synchronous>, transform_indices = @transform_6, window_bounds = array<i64: 1, 128>}, {pipeline_mode = #tpu.pipeline_mode<synchronous>, transform_indices = @transform_7, window_bounds = array<i64: 1, 1>}, {transform_indices = @transform_8, window_bounds = array<i64: 2, 128>}, {transform_indices = @transform_9, window_bounds = array<i64: 2, 128>}]} {
    %c0 = arith.constant 0 : index
    %c0_0 = arith.constant 0 : index
    %c0_1 = arith.constant 0 : index
    %0 = vector.load %arg2[%c0, %c0_0, %c0_1] : memref<2x128x128xf32, #tpu.memory_space<vmem>>, vector<2x128x128xf32>
    %1 = vector.shape_cast %0 : vector<2x128x128xf32> to vector<256x128xf32>
    %2 = arith.truncf %1 : vector<256x128xf32> to vector<256x128xbf16>
    %c0_2 = arith.constant 0 : index
    %c0_3 = arith.constant 0 : index
    %3 = vector.load %arg4[%c0_2, %c0_3] : memref<128x128xbf16, #tpu.memory_space<vmem>>, vector<128x128xbf16>
    %cst = arith.constant dense<0.000000e+00> : vector<256x128xf32>
    %4 = tpu.matmul %2, %3, %cst {dimension_numbers = #tpu.dot_dimension_numbers<[1], [0], [0], [1], [0, 0, 1, 1], [], []>} : vector<256x128xbf16>, vector<128x128xbf16>, vector<256x128xf32> -> vector<256x128xf32>
    %5 = vector.shape_cast %4 : vector<256x128xf32> to vector<2x128x128xf32>
    %c0_4 = arith.constant 0 : index
    %c0_5 = arith.constant 0 : index
    %6 = vector.load %arg3[%c0_4, %c0_5] : memref<2x32xf32, #tpu.memory_space<vmem>>, vector<2x32xf32>
    %c0_6 = arith.constant 0 : index
    %c0_7 = arith.constant 0 : index
    %7 = vector.load %arg6[%c0_6, %c0_7] : memref<32x128xf32, #tpu.memory_space<vmem>>, vector<32x128xf32>
    %cst_8 = arith.constant dense<0.000000e+00> : vector<2x128xf32>
    %8 = tpu.matmul %6, %7, %cst_8 {dimension_numbers = #tpu.dot_dimension_numbers<[1], [0], [0], [1], [0, 0, 1, 1], [], []>} : vector<2x32xf32>, vector<32x128xf32>, vector<2x128xf32> -> vector<2x128xf32>
    %c0_9 = arith.constant 0 : index
    %c0_10 = arith.constant 0 : index
    %9 = vector.load %arg5[%c0_9, %c0_10] : memref<1x128xf32, #tpu.memory_space<vmem>>, vector<1x128xf32>
    %10 = vector.broadcast %9 : vector<1x128xf32> to vector<2x128xf32>
    %11 = arith.addf %8, %10 : vector<2x128xf32>
    %12 = vector.shape_cast %11 : vector<2x128xf32> to vector<2x1x128xf32>
    %13 = vector.broadcast %12 : vector<2x1x128xf32> to vector<2x128x128xf32>
    %14 = arith.addf %5, %13 : vector<2x128x128xf32>
    %15 = math.tanh %14 : vector<2x128x128xf32>
    %c0_11 = arith.constant 0 : index
    %c0_12 = arith.constant 0 : index
    %16 = vector.load %arg7[%c0_11, %c0_12] : memref<1x128xf32, #tpu.memory_space<vmem>>, vector<1x128xf32>
    %17 = vector.shape_cast %16 : vector<1x128xf32> to vector<1x1x128xf32>
    %18 = vector.broadcast %17 : vector<1x1x128xf32> to vector<2x128x128xf32>
    %19 = arith.mulf %15, %18 : vector<2x128x128xf32>
    %cst_13 = arith.constant dense<0.000000e+00> : vector<2x128xf32>
    %20 = vector.multi_reduction <add>, %19, %cst_13 [2] : vector<2x128x128xf32> to vector<2x128xf32>
    %c0_14 = arith.constant 0 : index
    %c0_15 = arith.constant 0 : index
    %21 = vector.load %arg8[%c0_14, %c0_15] : memref<1x1xf32, #tpu.memory_space<vmem>>, vector<1x1xf32>
    %22 = vector.broadcast %21 : vector<1x1xf32> to vector<2x128xf32>
    %23 = arith.addf %20, %22 : vector<2x128xf32>
    %24 = tpu.iota {dimensions = array<i32: 1>} : vector<2x128xi32>
    %c0_16 = arith.constant 0 : index
    %c0_17 = arith.constant 0 : index
    %25 = vector.load %arg1[%c0_16, %c0_17] : memref<2x1xi32, #tpu.memory_space<vmem>>, vector<2x1xi32>
    %26 = vector.broadcast %25 : vector<2x1xi32> to vector<2x128xi32>
    %27 = arith.cmpi sge, %24, %26 : vector<2x128xi32>
    %cst_18 = arith.constant 0xFF800000 : f32
    %28 = vector.broadcast %cst_18 : f32 to vector<2x128xf32>
    %29 = arith.select %27, %28, %23 : vector<2x128xi1>, vector<2x128xf32>
    %cst_19 = arith.constant 2.000000e+00 : f32
    %30 = vector.broadcast %cst_19 : f32 to vector<2x128xf32>
    %31 = arith.mulf %30, %29 : vector<2x128xf32>
    %cst_20 = arith.constant dense<0xFF800000> : vector<2xf32>
    %32 = vector.multi_reduction <maximumf>, %31, %cst_20 [1] : vector<2x128xf32> to vector<2xf32>
    %33 = vector.shape_cast %32 : vector<2xf32> to vector<2x1xf32>
    %34 = vector.broadcast %33 : vector<2x1xf32> to vector<2x128xf32>
    %35 = arith.subf %31, %34 : vector<2x128xf32>
    %36 = math.exp %35 : vector<2x128xf32>
    %cst_21 = arith.constant dense<0.000000e+00> : vector<2xf32>
    %37 = vector.multi_reduction <add>, %36, %cst_21 [1] : vector<2x128xf32> to vector<2xf32>
    %38 = vector.shape_cast %37 : vector<2xf32> to vector<2x1xf32>
    %39 = vector.broadcast %38 : vector<2x1xf32> to vector<2x128xf32>
    %40 = arith.divf %36, %39 : vector<2x128xf32>
    %41 = vector.shape_cast %40 : vector<2x128xf32> to vector<2x128x1xf32>
    %42 = vector.broadcast %41 : vector<2x128x1xf32> to vector<2x128x128xf32>
    %43 = arith.mulf %0, %42 : vector<2x128x128xf32>
    %cst_22 = arith.constant dense<0.000000e+00> : vector<2x128xf32>
    %44 = vector.multi_reduction <add>, %43, %cst_22 [1] : vector<2x128x128xf32> to vector<2x128xf32>
    %c0_23 = arith.constant 0 : index
    %c0_24 = arith.constant 0 : index
    %45 = vector.load %arg10[%c0_23, %c0_24] : memref<2x128xf32, #tpu.memory_space<vmem>>, vector<2x128xf32>
    tpu.vector_store %arg10[%c0_23, %c0_24], %40 {strides = array<i32>} : memref<2x128xf32, #tpu.memory_space<vmem>>, vector<2x128xf32>,
    %c0_25 = arith.constant 0 : index
    %c0_26 = arith.constant 0 : index
    %46 = vector.load %arg9[%c0_25, %c0_26] : memref<2x128xf32, #tpu.memory_space<vmem>>, vector<2x128xf32>
    tpu.vector_store %arg9[%c0_25, %c0_26], %44 {strides = array<i32>} : memref<2x128xf32, #tpu.memory_space<vmem>>, vector<2x128xf32>,
    return
  }
  func.func @transform_0(%arg0: i32) -> (i32, i32) {
    %c0_i32 = arith.constant 0 : i32
    %c0_i32_0 = arith.constant 0 : i32
    return %arg0, %c0_i32 : i32, i32
  }
  func.func @transform_1(%arg0: i32) -> (i32, i32, i32) {
    %c0_i32 = arith.constant 0 : i32
    %c0_i32_0 = arith.constant 0 : i32
    %c0_i32_1 = arith.constant 0 : i32
    return %arg0, %c0_i32, %c0_i32_0 : i32, i32, i32
  }
  func.func @transform_2(%arg0: i32) -> (i32, i32) {
    %c0_i32 = arith.constant 0 : i32
    %c0_i32_0 = arith.constant 0 : i32
    return %arg0, %c0_i32 : i32, i32
  }
  func.func @transform_3(%arg0: i32) -> (i32, i32) {
    %c0_i32 = arith.constant 0 : i32
    %c0_i32_0 = arith.constant 0 : i32
    %c0_i32_1 = arith.constant 0 : i32
    return %c0_i32, %c0_i32_0 : i32, i32
  }
  func.func @transform_4(%arg0: i32) -> (i32, i32) {
    %c0_i32 = arith.constant 0 : i32
    %c0_i32_0 = arith.constant 0 : i32
    %c0_i32_1 = arith.constant 0 : i32
    return %c0_i32, %c0_i32_0 : i32, i32
  }
  func.func @transform_5(%arg0: i32) -> (i32, i32) {
    %c0_i32 = arith.constant 0 : i32
    %c0_i32_0 = arith.constant 0 : i32
    %c0_i32_1 = arith.constant 0 : i32
    return %c0_i32, %c0_i32_0 : i32, i32
  }
  func.func @transform_6(%arg0: i32) -> (i32, i32) {
    %c0_i32 = arith.constant 0 : i32
    %c0_i32_0 = arith.constant 0 : i32
    %c0_i32_1 = arith.constant 0 : i32
    return %c0_i32, %c0_i32_0 : i32, i32
  }
  func.func @transform_7(%arg0: i32) -> (i32, i32) {
    %c0_i32 = arith.constant 0 : i32
    %c0_i32_0 = arith.constant 0 : i32
    %c0_i32_1 = arith.constant 0 : i32
    return %c0_i32, %c0_i32_0 : i32, i32
  }
  func.func @transform_8(%arg0: i32) -> (i32, i32) {
    %c0_i32 = arith.constant 0 : i32
    %c0_i32_0 = arith.constant 0 : i32
    return %arg0, %c0_i32 : i32, i32
  }
  func.func @transform_9(%arg0: i32) -> (i32, i32) {
    %c0_i32 = arith.constant 0 : i32
    %c0_i32_0 = arith.constant 0 : i32
    return %arg0, %c0_i32 : i32, i32
  }
}

</mosaic_0001>

<bundles_post_ra>
// kernel: tpu_custom_call.1
= control target key start
LH: loop header
LB: loop body
LE: loop exit
PB: predicated region body
PF: predicated region fallthrough
CT: control target
= control target key end

     0   :  { %s1745_s0 = inlined_call_operand.vmem [shape: s32[2,1], index: 0, kind: input, shape index: {}]   ;;  %s1746_s1 = inlined_call_operand.hbm [shape: f32[2,128,128], index: 1, kind: input, shape index: {}]   ;;  %s1747_s2 = inlined_call_operand.vmem [shape: f32[2,32], index: 2, kind: input, shape index: {}]   ;;  %s1748_s3 = inlined_call_operand.hbm [shape: bf16[128,128], index: 3, kind: input, shape index: {}]   ;;  %s1749_s4 = inlined_call_operand.vmem [shape: f32[1,128], index: 4, kind: input, shape index: {}]   ;;  %s1750_s5 = inlined_call_operand.hbm [shape: f32[32,128], index: 5, kind: input, shape index: {}]   ;;  %s1751_s6 = inlined_call_operand.vmem [shape: f32[1,128], index: 6, kind: input, shape index: {}]   ;;  %s1752_s7 = inlined_call_operand.<no memory space> [shape: f32[1,1], index: 7, kind: input, shape index: {}]   ;;  %s1753_s8 = inlined_call_operand.hbm [shape: f32[2,128], index: 8, kind: output, shape index: {0}]   ;;  %s1754_s9 = inlined_call_operand.hbm [shape: f32[2,128], index: 9, kind: output, shape index: {1}]  }
   0x1   :  { %v15_v0 = vstv %s1752_s7 }
   0x2   :  { %16 = vst [vmem:[#allocation2] sm:$0x1] %v15_v0 }
   0x3   :  { %17 = vsyncpa [#allocation4], 0 }
   0x4   :  { %18 = vsyncpa [#allocation7], 0 }
   0x5   :  { %19 = vsyncpa [#allocation5], 0  ;;  %s42_s13 = sshll.u32 %s1748_s3, 4  ;;  %s43_s13 = int_to_ptr.hbm [resolvable:$true] %s42_s13 }
   0x6   :  { %20 = vsyncpa [#allocation11], 0  ;;  %s1332_s14 = smov [#allocation6]   ;;  %s27_s18 = sshll.u32 %s1746_s1, 4  ;;  %s28_s18 = int_to_ptr.hbm [resolvable:$true] %s27_s18 }
   0x7   :  { %s44_s15 = sshll.u32 %s1332_s14, 4  ;;  %s1333_s19 = smov 64   ;;  %s45_s15 = int_to_ptr.vmem [resolvable:$true] %s44_s15 }
   0x8   :  { %s1334_s20 = smov 4   ;;  %s1335_s7 = smov [#allocation3]  }
   0x9   :  { %50 = dma.hbm_to_vmem [thread:$0]  %s43_s13, 1024, %s45_s15, [#allocation7], %s1333_s19, %s1333_s19, %s1334_s20  }
   0xa   :  { %s29_s21 = sshll.u32 %s1335_s7, 4  ;;  %s1336_s22 = smov 128   ;;  %s30_s21 = int_to_ptr.vmem [resolvable:$true] %s29_s21 }
   0xb   :  { %s1337_s23 = smov 8   ;;  %s57_s25 = sshll.u32 %s1750_s5, 4  ;;  %s58_s25 = int_to_ptr.hbm [resolvable:$true] %s57_s25 }
   0xc   :  { %35 = dma.hbm_to_vmem [thread:$0]  %s28_s18, 4096, %s30_s21, [#allocation4], %s1336_s22, %s1336_s22, %s1337_s23  }
   0xd   :  { %s1338_s26 = smov [#allocation8]  }
   0xe   :  { %s59_s27 = sshll.u32 %s1338_s26, 4  ;;  %s60_s27 = int_to_ptr.vmem [resolvable:$true] %s59_s27 }
   0xf   :  { %65 = dma.hbm_to_vmem [thread:$0]  %s58_s25, 512, %s60_s27, [#allocation7], %s1336_s22, %s1336_s22, %s1337_s23  }
  0x10   :  { %1324 = dma.done.wait [#allocation4], 4096  }
  0x11   :  { %1325 = vsyncadd [#allocation4], 4294963200 }
  0x12   :  { %1326 = dma.done.wait [#allocation7], 1536  }
  0x13   :  { %1327 = vsyncadd [#allocation7], 4294965760  ;;  %v1034_v1 = vld [vmem:[#allocation6 + $0x38] sm:$0xff]  ;;  %v1033_v2 = vld [vmem:[#allocation6 + $0x30] sm:$0xff]  ;;  %vm292_vm0 = vcmask 261120   ;;  %vm567_vm1 = vcmask 130112  }
  0x14   :  { %194 = vmatpush.bf16.msra.mxu0 %v1034_v1  ;;  %1035 = vmatpush.bf16.msra.mxu1 %v1034_v1  ;;  %v1032_v3 = vld [vmem:[#allocation6 + $0x28] sm:$0xff]  ;;  %v1031_v4 = vld [vmem:[#allocation6 + $0x20] sm:$0xff]  ;;  %v1030_v5 = vld [vmem:[#allocation6 + $0x18] sm:$0xff]  ;;  %vm571_vm2 = vcmask 195712   ;;  %vm575_vm3 = vcmask 261312   ;;  %vm579_vm4 = vcmask 326912  }
  0x15   :  { %1036 = vmatpush.bf16.msra.mxu2 %v1034_v1  ;;  %1037 = vmatpush.bf16.msra.mxu3 %v1034_v1  ;;  %v1029_v6 = vld [vmem:[#allocation6 + $0x10] sm:$0xff]  ;;  %v1028_v7 = vld [vmem:[#allocation6 + $0x8] sm:$0xff]  ;;  %v1027_v8 = vld [vmem:[#allocation6] sm:$0xff]  ;;  %vm583_vm5 = vcmask 392512   ;;  %vm587_vm6 = vcmask 458112   ;;  %vm591_vm7 = vcmask 523712  }
  0x16   :  { %v82_v9 = vld [vmem:[#allocation3] sm:$0xff]  ;;  %v83_v10 = vld [vmem:[#allocation3 + $0x8] sm:$0xff]  ;;  %v96_v13 = vld [vmem:[#allocation3 + $0x70] sm:$0xff]  ;;  %vm595_vm8 = vcmask 589312   ;;  %vm599_vm9 = vcmask 654912   ;;  %vm603_vm10 = vcmask 720512  }
  0x17   :  { %v90_v11 = vld [vmem:[#allocation3 + $0x40] sm:$0xff]  ;;  %v91_v12 = vld [vmem:[#allocation3 + $0x48] sm:$0xff]  ;;  %v97_v14 = vld [vmem:[#allocation3 + $0x78] sm:$0xff]  ;;  %v114_v17 = vpack.c.bf16 %v83_v10, %v82_v9  ;;  %vm607_vm11 = vcmask 786112   ;;  %vm611_vm12 = vcmask 851712   ;;  %vm615_vm13 = vcmask 917312  }
  0x18   :  { %195 = vmatpush.bf16.msra.mxu0 %v1033_v2  ;;  %1038 = vmatpush.bf16.msra.mxu1 %v1033_v2  ;;  %v104_v15 = vld [vmem:[#allocation3 + $0xb0] sm:$0xff]  ;;  %v105_v16 = vld [vmem:[#allocation3 + $0xb8] sm:$0xff]  ;;  %v118_v18 = vpack.c.bf16 %v91_v12, %v90_v11  ;;  %v121_v20 = vpack.c.bf16 %v97_v14, %v96_v13  ;;  %v285_v23 = vld [vmem:[#allocation8 + $0x8] sm:$0xff]  ;;  %vm619_vm14 = vcmask 982912   ;;  %vm623_vm15 = vcmask 1048512   ;;  %s978_s11 = sshll.u32 %s1754_s9, 4  ;;  %s979_s11 = int_to_ptr.hbm [resolvable:$true] %s978_s11 }
  0x19   :  { %1039 = vmatpush.bf16.msra.mxu2 %v1033_v2  ;;  %1040 = vmatpush.bf16.msra.mxu3 %v1033_v2  ;;  %v287_v19 = vld [vmem:[#allocation8 + $0x18] sm:$0xff]  ;;  %v125_v21 = vpack.c.bf16 %v105_v16, %v104_v15  ;;  %v286_v22 = vld [vmem:[#allocation8 + $0x10] sm:$0xff]  ;;  %v284_v24 = vld [vmem:[#allocation8] sm:$0xff]  ;;  %s1340_s12 = smov [#allocation10]   ;;  %s1341_s9 = smov [#allocation9]  }
  0x1a   :  { %v84_v25 = vld [vmem:[#allocation3 + $0x10] sm:$0xff]  ;;  %v85_v26 = vld [vmem:[#allocation3 + $0x18] sm:$0xff]  ;;  %v98_v29 = vld [vmem:[#allocation3 + $0x80] sm:$0xff]  ;;  %s976_s13 = sshll.u32 %s1340_s12, 4  ;;  %s965_s14 = sshll.u32 %s1341_s9, 4  ;;  %s977_s13 = int_to_ptr.vmem [resolvable:$true] %s976_s13  ;;  %s966_s14 = int_to_ptr.vmem [resolvable:$true] %s965_s14 }
  0x1b   :  { %v92_v27 = vld [vmem:[#allocation3 + $0x50] sm:$0xff]  ;;  %v93_v28 = vld [vmem:[#allocation3 + $0x58] sm:$0xff]  ;;  %v99_v30 = vld [vmem:[#allocation3 + $0x88] sm:$0xff]  ;;  %v115_v33 = vpack.c.bf16 %v85_v26, %v84_v25  ;;  %s967_s17 = sshll.u32 %s1753_s8, 4  ;;  %s968_s17 = int_to_ptr.hbm [resolvable:$true] %s967_s17 }
  0x1c   :  { %196 = vmatpush.bf16.msra.mxu0 %v1032_v3  ;;  %1041 = vmatpush.bf16.msra.mxu1 %v1032_v3  ;;  %v106_v31 = vld [vmem:[#allocation3 + $0xc0] sm:$0xff]  ;;  %v107_v32 = vld [vmem:[#allocation3 + $0xc8] sm:$0xff]  ;;  %v119_v34 = vpack.c.bf16 %v93_v28, %v92_v27  ;;  %v122_v35 = vpack.c.bf16 %v99_v30, %v98_v29  ;;  %v100_v41 = vld [vmem:[#allocation3 + $0x90] sm:$0xff] }
  0x1d   :  { %1042 = vmatpush.bf16.msra.mxu2 %v1032_v3  ;;  %1043 = vmatpush.bf16.msra.mxu3 %v1032_v3  ;;  %v126_v36 = vpack.c.bf16 %v107_v32, %v106_v31  ;;  %v1404_v37 = vld [vmem:[#allocation3 + $0x20] sm:$0xff]  ;;  %v87_v38 = vld [vmem:[#allocation3 + $0x28] sm:$0xff]  ;;  %v101_v42 = vld [vmem:[#allocation3 + $0x98] sm:$0xff] }
  0x1e   :  { %v94_v39 = vld [vmem:[#allocation3 + $0x60] sm:$0xff]  ;;  %v95_v40 = vld [vmem:[#allocation3 + $0x68] sm:$0xff]  ;;  %v108_v43 = vld [vmem:[#allocation3 + $0xd0] sm:$0xff]  ;;  %v116_v45 = vpack.c.bf16 %v87_v38, %v1404_v37  ;;  %v123_v47 = vpack.c.bf16 %v101_v42, %v100_v41 }
  0x1f   :  { %v109_v44 = vld [vmem:[#allocation3 + $0xd8] sm:$0xff]  ;;  %v120_v46 = vpack.c.bf16 %v95_v40, %v94_v39  ;;  %v1407_v49 = vld [vmem:[#allocation3 + $0x30] sm:$0xff]  ;;  %v102_v51 = vld [vmem:[#allocation3 + $0xa0] sm:$0xff] }
  0x20   :  { %197 = vmatpush.bf16.msra.mxu0 %v1031_v4  ;;  %1044 = vmatpush.bf16.msra.mxu1 %v1031_v4  ;;  %v127_v48 = vpack.c.bf16 %v109_v44, %v108_v43  ;;  %v1409_v50 = vld [vmem:[#allocation3 + $0x38] sm:$0xff]  ;;  %v103_v52 = vld [vmem:[#allocation3 + $0xa8] sm:$0xff]  ;;  %v110_v53 = vld [vmem:[#allocation3 + $0xe0] sm:$0xff] }
  0x21   :  { %1045 = vmatpush.bf16.msra.mxu2 %v1031_v4  ;;  %1046 = vmatpush.bf16.msra.mxu3 %v1031_v4  ;;  %v111_v54 = vld [vmem:[#allocation3 + $0xe8] sm:$0xff]  ;;  %v117_v55 = vpack.c.bf16 %v1409_v50, %v1407_v49  ;;  %v124_v56 = vpack.c.bf16 %v103_v52, %v102_v51  ;;  %v283_v58 = vld [vmem:[%s1747_s2] sm:$0x3]  ;;  %v112_v59 = vld [vmem:[#allocation3 + $0xf0] sm:$0xff] }
  0x22   :  { %v128_v57 = vpack.c.bf16 %v111_v54, %v110_v53  ;;  %v113_v60 = vld [vmem:[#allocation3 + $0xf8] sm:$0xff] }
  0x23   :  { %v129_v61 = vpack.c.bf16 %v113_v60, %v112_v59  ;;  %v1104_v11 = vld [vmem:[%s1749_s4] ss:$0 sm:$0xff] }
  0x24   :  { %198 = vmatpush.bf16.msra.mxu0 %v1030_v5  ;;  %1047 = vmatpush.bf16.msra.mxu1 %v1030_v5 }
  0x25   :  { %1048 = vmatpush.bf16.msra.mxu2 %v1030_v5  ;;  %1049 = vmatpush.bf16.msra.mxu3 %v1030_v5 }
  0x28   :  { %199 = vmatpush.bf16.msra.mxu0 %v1029_v6  ;;  %1050 = vmatpush.bf16.msra.mxu1 %v1029_v6 }
  0x29   :  { %1051 = vmatpush.bf16.msra.mxu2 %v1029_v6  ;;  %1052 = vmatpush.bf16.msra.mxu3 %v1029_v6 }
  0x2c   :  { %200 = vmatpush.bf16.msra.mxu0 %v1028_v7  ;;  %1053 = vmatpush.bf16.msra.mxu1 %v1028_v7 }
  0x2d   :  { %1054 = vmatpush.bf16.msra.mxu2 %v1028_v7  ;;  %1055 = vmatpush.bf16.msra.mxu3 %v1028_v7 }
  0x30   :  { %201 = vmatpush.bf16.msra.mxu0 %v1027_v8  ;;  %1056 = vmatpush.bf16.msra.mxu1 %v1027_v8 }
  0x31   :  { %1057 = vmatpush.bf16.msra.mxu2 %v1027_v8  ;;  %1058 = vmatpush.bf16.msra.mxu3 %v1027_v8 }
  0x33   :  { %202 = vmatmul.bf16.vlgmr.msra.gmra.mxu0 %v114_v17  ;;  %222 = vmatmul.bf16.vlgmr.msra.gmra.mxu1 %v118_v18 }
  0x34   :  { %308 = vmatpush.msrb.mxu1 %v287_v19  ;;  %237 = vmatmul.bf16.vlgmr.msra.gmra.mxu2 %v121_v20 }
  0x35   :  { %257 = vmatmul.bf16.vlgmr.msra.gmra.mxu3 %v125_v21 }
  0x36   :  { %309 = vmatpush.msrb.mxu1 %v286_v22 }
  0x38   :  { %310 = vmatpush.msrb.mxu1 %v285_v23  ;;  %v1440_v23 = vld [vmem:[%s1751_s6] ss:$0 sm:$0xff] }
  0x3a   :  { %311 = vmatpush.msrb.mxu1 %v284_v24 }
  0x43   :  { %207 = vmatmul.bf16.gmra.mxu0 %v115_v33  ;;  %227 = vmatmul.bf16.gmra.mxu1 %v119_v34 }
  0x44   :  { %242 = vmatmul.bf16.gmra.mxu2 %v122_v35 }
  0x45   :  { %262 = vmatmul.bf16.gmra.mxu3 %v126_v36 }
  0x53   :  { %212 = vmatmul.bf16.gmra.mxu0 %v116_v45  ;;  %232 = vmatmul.bf16.gmra.mxu1 %v120_v46 }
  0x54   :  { %247 = vmatmul.bf16.gmra.mxu2 %v123_v47 }
  0x55   :  { %267 = vmatmul.bf16.gmra.mxu3 %v127_v48 }
  0x63   :  { %217 = vmatmul.bf16.gmra.mxu0 %v117_v55  ;;  %1026 = vmatmul.msk.f32.vlgmr.msrb.gmra.mxu1 %vm292_vm0, %v283_v58  ;;  %vm656_vm0 = vcmask 1041409  }
  0x64   :  { %252 = vmatmul.bf16.gmra.mxu2 %v124_v56 }
  0x65   :  { %272 = vmatmul.bf16.gmra.mxu3 %v128_v57 }
  0x75   :  { %277 = vmatmul.bf16.gmra.mxu3 %v129_v61 }
  0xb0   :  { %v223_v62 = vpop.f32.mrf.mxu1  ;;  %v203_v63 = vpop.f32.mrf.mxu0 }
  0xb7   :  { %v1416_v5 = vpop.f32.mrf.mxu2 }
  0xb8   :  { %v225_v0 = vpop.f32.mrf.mxu1  ;;  %v205_v1 = vpop.f32.mrf.mxu0 }
  0xb9   :  { %v1425_v12 = vpop.f32.mrf.mxu3 }
  0xbf   :  { %v1420_v9 = vpop.f32.mrf.mxu2 }
  0xc0   :  { %v228_v2 = vpop.f32.mrf.mxu1  ;;  %v208_v3 = vpop.f32.mrf.mxu0 }
  0xc1   :  { %v1434_v21 = vpop.f32.mrf.mxu3 }
  0xc7   :  { %v1429_v16 = vpop.f32.mrf.mxu2 }
  0xc8   :  { %v230_v4 = vpop.f32.mrf.mxu1  ;;  %v210_v7 = vpop.f32.mrf.mxu0 }
  0xc9   :  { %v1450_v35 = vpop.f32.mrf.mxu3 }
  0xcf   :  { %v1444_v28 = vpop.f32.mrf.mxu2 }
  0xd0   :  { %v1418_v6 = vpop.f32.mrf.mxu1  ;;  %v213_v10 = vpop.f32.mrf.mxu0 }
  0xd1   :  { %v1460_v54 = vpop.f32.mrf.mxu3 }
  0xd7   :  { %v248_v44 = vpop.f32.mrf.mxu2 }
  0xd8   :  { %v235_v8 = vpop.f32.mrf.mxu1  ;;  %v215_v20 = vpop.f32.mrf.mxu0 }
  0xdf   :  { %v250_v61 = vpop.f32.mrf.mxu2 }
  0xe0   :  { %v313_v13 = vpop.f32.mrf.mxu1  ;;  %v218_v32 = vpop.f32.mrf.mxu0 }
  0xe1   :  { %v314_v14 = vadd.f32 %v1104_v11, %v313_v13 }
  0xe3   :  { %v1427_v15 = vperm.slane %v314_v14, 0  ;;  %v317_v47 = vrot.slane %v314_v14, 1 }
  0xe5   :  { %v322_v17 = vadd.f32 %v1427_v15, %v203_v63  ;;  %v324_v18 = vadd.f32 %v1427_v15, %v208_v3  ;;  %v326_v19 = vadd.f32 %v1427_v15, %v213_v10  ;;  %v323_v22 = vadd.f32 %v1427_v15, %v205_v1  ;;  %v1473_v3 = vpop.f32.mrf.mxu3 }
  0xe6   :  { %v325_v24 = vadd.f32 %v1427_v15, %v210_v7  ;;  %v327_v25 = vadd.f32 %v1427_v15, %v215_v20  ;;  %v328_v34 = vadd.f32 %v1427_v15, %v218_v32  ;;  %v332_v36 = vadd.f32 %v1427_v15, %v228_v2 }
  0xe7   :  { %1107 = vtanh.f32 %v322_v17  ;;  %v330_v39 = vadd.f32 %v1427_v15, %v223_v62  ;;  %v331_v46 = vadd.f32 %v1427_v15, %v225_v0  ;;  %v335_v48 = vadd.f32 %v1427_v15, %v235_v8  ;;  %v253_v14 = vpop.f32.mrf.mxu2 }
  0xe8   :  { %1109 = vtanh.f32 %v324_v18  ;;  %v333_v52 = vadd.f32 %v1427_v15, %v230_v4  ;;  %v1462_v56 = vperm.slane %v317_v47, 0  ;;  %v334_v60 = vadd.f32 %v1427_v15, %v1418_v6 }
  0xe9   :  { %1111 = vtanh.f32 %v326_v19  ;;  %v336_v0 = vadd.f32 %v1427_v15, %v1416_v5  ;;  %v337_v8 = vadd.f32 %v1427_v15, %v1420_v9 }
  0xea   :  { %1113 = vtanh.f32 %v323_v22  ;;  %v338_v62 = vadd.f32 %v1462_v56, %v1429_v16  ;;  %v341_v5 = vadd.f32 %v1462_v56, %v250_v61  ;;  %v339_v11 = vadd.f32 %v1462_v56, %v1444_v28 }
  0xeb   :  { %1115 = vtanh.f32 %v325_v24  ;;  %v340_v20 = vadd.f32 %v1462_v56, %v248_v44  ;;  %v344_v22 = vadd.f32 %v1462_v56, %v1425_v12 }
  0xec   :  { %1117 = vtanh.f32 %v327_v25  ;;  %v342_v25 = vadd.f32 %v1462_v56, %v253_v14 }
  0xed   :  { %v1108_v26 = vpop.eup %1107  ;;  %1119 = vtanh.f32 %v328_v34  ;;  %v270_v19 = vpop.f32.mrf.mxu3 }
  0xee   :  { %v1110_v27 = vpop.eup %1109  ;;  %v390_v29 = vmul.f32 %v1108_v26, %v1440_v23  ;;  %1121 = vtanh.f32 %v332_v36 }
  0xef   :  { %v1112_v30 = vpop.eup %1111  ;;  %v392_v31 = vmul.f32 %v1110_v27, %v1440_v23  ;;  %1123 = vtanh.f32 %v330_v39  ;;  %v255_v28 = vpop.f32.mrf.mxu2  ;;  %v1339_v39 = vmov 0  }
  0xf0   :  { %422 = vadd.xlane.f32.xlu0 %v390_v29  ;;  %v394_v33 = vmul.f32 %v1112_v30, %v1440_v23  ;;  %v1114_v38 = vpop.eup %1113  ;;  %1125 = vtanh.f32 %v331_v46  ;;  %v220_v30 = vpop.f32.mrf.mxu0  ;;  %1070 = vset.pattern.permute.xlu1 %v1339_v39 }
  0xf1   :  { %426 = vadd.xlane.f32.xlu1 %v392_v31  ;;  %v1116_v40 = vpop.eup %1115  ;;  %v391_v42 = vmul.f32 %v1114_v38, %v1440_v23  ;;  %1127 = vtanh.f32 %v335_v48  ;;  %v329_v34 = vadd.f32 %v1427_v15, %v220_v30  ;;  %v345_v38 = vadd.f32 %v1462_v56, %v1434_v21  ;;  %1069 = vset.pattern.permute.xlu0 %v1339_v39 }
  0xf2   :  { %430 = vadd.xlane.f32.xlu2 %v394_v33  ;;  %v1118_v41 = vpop.eup %1117  ;;  %v393_v43 = vmul.f32 %v1116_v40, %v1440_v23  ;;  %1129 = vtanh.f32 %v333_v52  ;;  %v343_v33 = vadd.f32 %v1462_v56, %v255_v28  ;;  %v346_v15 = vadd.f32 %v1462_v56, %v1450_v35 }
  0xf3   :  { %v395_v45 = vmul.f32 %v1118_v41, %v1440_v23  ;;  %v1120_v51 = vpop.eup %1119  ;;  %1131 = vtanh.f32 %v334_v60  ;;  %v348_v35 = vadd.f32 %v1462_v56, %v1473_v3 }
  0xf4   :  { %v1122_v53 = vpop.eup %1121  ;;  %v396_v57 = vmul.f32 %v1120_v51, %v1440_v23  ;;  %1133 = vtanh.f32 %v338_v62 }
  0xf5   :  { %v1124_v55 = vpop.eup %1123  ;;  %v400_v58 = vmul.f32 %v1122_v53, %v1440_v23  ;;  %1135 = vtanh.f32 %v336_v0  ;;  %v273_v12 = vpop.f32.mrf.mxu3 }
  0xf6   :  { %v398_v59 = vmul.f32 %v1124_v55, %v1440_v23  ;;  %v1126_v63 = vpop.eup %1125  ;;  %1137 = vtanh.f32 %v337_v8  ;;  %v349_v55 = vadd.f32 %v1462_v56, %v270_v19  ;;  %v350_v61 = vadd.f32 %v1462_v56, %v273_v12 }
  0xf7   :  { %v1128_v1 = vpop.eup %1127  ;;  %v399_v4 = vmul.f32 %v1126_v63, %v1440_v23  ;;  %1139 = vtanh.f32 %v341_v5 }
  0xf8   :  { %424 = vadd.xlane.f32.xlu0 %v391_v42  ;;  %v1130_v2 = vpop.eup %1129  ;;  %v403_v7 = vmul.f32 %v1128_v1, %v1440_v23  ;;  %1141 = vtanh.f32 %v339_v11 }
  0xf9   :  { %428 = vadd.xlane.f32.xlu1 %v393_v43  ;;  %v401_v6 = vmul.f32 %v1130_v2, %v1440_v23  ;;  %v1132_v10 = vpop.eup %1131  ;;  %1143 = vtanh.f32 %v340_v20 }
  0xfa   :  { %432 = vadd.xlane.f32.xlu2 %v395_v45  ;;  %v1134_v13 = vpop.eup %1133  ;;  %v402_v17 = vmul.f32 %v1132_v10, %v1440_v23  ;;  %1145 = vtanh.f32 %v344_v22  ;;  %v347_v45 = vadd.f32 %v1462_v56, %v1460_v54 }
  0xfb   :  { %v1136_v16 = vpop.eup %1135  ;;  %v406_v18 = vmul.f32 %v1134_v13, %v1440_v23  ;;  %1147 = vtanh.f32 %v342_v25 }
  0xfc   :  { %v404_v9 = vmul.f32 %v1136_v16, %v1440_v23  ;;  %v1138_v24 = vpop.eup %1137  ;;  %1149 = vtanh.f32 %v343_v33 }
  0xfd   :  { %v1140_v26 = vpop.eup %1139  ;;  %v405_v29 = vmul.f32 %v1138_v24, %v1440_v23  ;;  %1151 = vtanh.f32 %v329_v34  ;;  %v275_v47 = vpop.f32.mrf.mxu3 }
  0xfe   :  { %v1142_v27 = vpop.eup %1141  ;;  %v409_v31 = vmul.f32 %v1140_v26, %v1440_v23  ;;  %1153 = vtanh.f32 %v345_v38  ;;  %v351_v62 = vadd.f32 %v1462_v56, %v275_v47 }
  0xff   :  { %v407_v32 = vmul.f32 %v1142_v27, %v1440_v23  ;;  %v1144_v36 = vpop.eup %1143  ;;  %1155 = vtanh.f32 %v346_v15 }
 0x100   :  { %434 = vadd.xlane.f32.xlu0 %v396_v57  ;;  %v1146_v40 = vpop.eup %1145  ;;  %v408_v42 = vmul.f32 %v1144_v36, %v1440_v23  ;;  %1157 = vtanh.f32 %v347_v45 }
 0x101   :  { %442 = vadd.xlane.f32.xlu1 %v400_v58  ;;  %v1148_v41 = vpop.eup %1147  ;;  %v412_v43 = vmul.f32 %v1146_v40, %v1440_v23  ;;  %1159 = vtanh.f32 %v348_v35 }
 0x102   :  { %438 = vadd.xlane.f32.xlu2 %v398_v59  ;;  %v410_v44 = vmul.f32 %v1148_v41, %v1440_v23  ;;  %v1150_v21 = vpop.eup %1149  ;;  %1161 = vtanh.f32 %v349_v55 }
 0x103   :  { %v1152_v46 = vpop.eup %1151  ;;  %v411_v51 = vmul.f32 %v1150_v21, %v1440_v23  ;;  %1163 = vtanh.f32 %v350_v61 }
 0x104   :  { %v1154_v48 = vpop.eup %1153  ;;  %v397_v52 = vmul.f32 %v1152_v46, %v1440_v23  ;;  %1165 = vtanh.f32 %v351_v62 }
 0x105   :  { %v413_v53 = vmul.f32 %v1154_v48, %v1440_v23  ;;  %v1156_v54 = vpop.eup %1155  ;;  %v278_v58 = vpop.f32.mrf.mxu3 }
 0x106   :  { %v1158_v57 = vpop.eup %1157  ;;  %v414_v59 = vmul.f32 %v1156_v54, %v1440_v23 }
 0x107   :  { %v415_v60 = vmul.f32 %v1158_v57, %v1440_v23  ;;  %v1160_v63 = vpop.eup %1159 }
 0x108   :  { %440 = vadd.xlane.f32.xlu0 %v399_v4  ;;  %v1162_v0 = vpop.eup %1161  ;;  %v416_v1 = vmul.f32 %v1160_v63, %v1440_v23  ;;  %v1106_v4 = vld [vmem:[#allocation2] ss:$0 sm:$0xff] }
 0x109   :  { %448 = vadd.xlane.f32.xlu1 %v403_v7  ;;  %v417_v3 = vmul.f32 %v1162_v0, %v1440_v23  ;;  %v352_v7 = vadd.f32 %v1462_v56, %v278_v58  ;;  %v1164_v8 = vpop.eup %1163 }
 0x10a   :  { %444 = vadd.xlane.f32.xlu2 %v401_v6  ;;  %v1166_v5 = vpop.eup %1165  ;;  %v418_v10 = vmul.f32 %v1164_v8, %v1440_v23 }
 0x10b   :  { %1167 = vtanh.f32 %v352_v7  ;;  %v419_v11 = vmul.f32 %v1166_v5, %v1440_v23 }
 0x10d   :  { %v280_v2 = vpop.f32.mrf.mxu3 }
 0x10e   :  { %v353_v6 = vadd.f32 %v1462_v56, %v280_v2  ;;  %v527_v56 = vld [vmem:[%s1745_s0] sm:$0x3] }
 0x110   :  { %446 = vadd.xlane.f32.xlu0 %v402_v17  ;;  %1169 = vtanh.f32 %v353_v6 }
 0x111   :  { %454 = vadd.xlane.f32.xlu1 %v406_v18  ;;  %v1168_v13 = vpop.eup %1167 }
 0x112   :  { %450 = vadd.xlane.f32.xlu2 %v404_v9  ;;  %v420_v16 = vmul.f32 %v1168_v13, %v1440_v23 }
 0x116   :  { %v1170_v14 = vpop.eup %1169 }
 0x117   :  { %v421_v17 = vmul.f32 %v1170_v14, %v1440_v23 }
 0x118   :  { %452 = vadd.xlane.f32.xlu0 %v405_v29 }
 0x119   :  { %460 = vadd.xlane.f32.xlu1 %v409_v31 }
 0x11a   :  { %456 = vadd.xlane.f32.xlu2 %v407_v32 }
 0x120   :  { %458 = vadd.xlane.f32.xlu0 %v408_v42 }
 0x121   :  { %466 = vadd.xlane.f32.xlu1 %v412_v43 }
 0x122   :  { %462 = vadd.xlane.f32.xlu2 %v410_v44  ;;  %v525_v44 = vlaneseq }
 0x124   :  { %v1530_v21 = vand.u32 127, %v525_v44 }
 0x126   :  { %v1535_v46 = vadd.s32 4294967192, %v1530_v21  ;;  %v1538_v47 = vadd.s32 4294967288, %v1530_v21  ;;  %v1541_v48 = vadd.s32 4294967280, %v1530_v21  ;;  %v1550_v35 = vadd.s32 4294967256, %v1530_v21 }
 0x127   :  { %v1553_v55 = vadd.s32 4294967248, %v1530_v21  ;;  %v1556_v54 = vadd.s32 4294967240, %v1530_v21  ;;  %v1559_v57 = vadd.s32 4294967232, %v1530_v21  ;;  %v1569_v61 = vadd.s32 4294967208, %v1530_v21 }
 0x128   :  { %464 = vadd.xlane.f32.xlu0 %v411_v51  ;;  %v1544_v51 = vadd.s32 4294967272, %v1530_v21 }
 0x129   :  { %436 = vadd.xlane.f32.xlu1 %v397_v52  ;;  %v1547_v52 = vadd.s32 4294967264, %v1530_v21 }
 0x12a   :  { %468 = vadd.xlane.f32.xlu2 %v413_v53 }
 0x131   :  { %470 = vadd.xlane.f32.xlu1 %v414_v59  ;;  %v1563_v59 = vadd.s32 4294967224, %v1530_v21 }
 0x132   :  { %472 = vadd.xlane.f32.xlu2 %v415_v60  ;;  %v1566_v60 = vadd.s32 4294967216, %v1530_v21 }
 0x139   :  { %474 = vadd.xlane.f32.xlu1 %v416_v1  ;;  %v1577_v1 = vadd.s32 4294967200, %v1530_v21 }
 0x13a   :  { %476 = vadd.xlane.f32.xlu2 %v417_v3 }
 0x13c   :  { %490 = vperm.xlu0 %1069, %v1106_v4  }
 0x141   :  { %478 = vadd.xlane.f32.xlu1 %v418_v10 }
 0x142   :  { %480 = vadd.xlane.f32.xlu2 %v419_v11 }
 0x149   :  { %482 = vadd.xlane.f32.xlu1 %v420_v16 }
 0x14a   :  { %484 = vadd.xlane.f32.xlu2 %v421_v17 }
 0x162   :  { %529 = vperm.xlu1 %1070, %v527_v56  }
 0x163   :  { %v423_v18 = vpop.xlane.xlu0 %422 }
 0x164   :  { %v427_v19 = vpop.xlane.xlu1 %426 }
 0x165   :  { %v431_v9 = vpop.xlane.xlu2 %430 }
 0x16b   :  { %v425_v20 = vpop.xlane.xlu0 %424 }
 0x16c   :  { %v429_v22 = vpop.xlane.xlu1 %428 }
 0x16d   :  { %v433_v24 = vpop.xlane.xlu2 %432 }
 0x173   :  { %v435_v26 = vpop.xlane.xlu0 %434 }
 0x174   :  { %v443_v25 = vpop.xlane.xlu1 %442 }
 0x175   :  { %v439_v27 = vpop.xlane.xlu2 %438 }
 0x17b   :  { %v441_v30 = vpop.xlane.xlu0 %440 }
 0x17c   :  { %v449_v28 = vpop.xlane.xlu1 %448 }
 0x17d   :  { %v445_v29 = vpop.xlane.xlu2 %444 }
 0x183   :  { %v447_v32 = vpop.xlane.xlu0 %446 }
 0x184   :  { %v455_v23 = vpop.xlane.xlu1 %454 }
 0x185   :  { %v1525_v31 = vpop.xlane.xlu2 %450 }
 0x18b   :  { %v1527_v34 = vpop.xlane.xlu0 %452 }
 0x18c   :  { %v461_v33 = vpop.xlane.xlu1 %460 }
 0x18d   :  { %v457_v12 = vpop.xlane.xlu2 %456 }
 0x193   :  { %v459_v39 = vpop.xlane.xlu0 %458 }
 0x194   :  { %v467_v36 = vpop.xlane.xlu1 %466 }
 0x195   :  { %v463_v38 = vpop.xlane.xlu2 %462 }
 0x19b   :  { %v465_v42 = vpop.xlane.xlu0 %464 }
 0x19c   :  { %v437_v40 = vpop.xlane.xlu1 %436 }
 0x19d   :  { %v469_v41 = vpop.xlane.xlu2 %468 }
 0x1a4   :  { %v471_v43 = vpop.xlane.xlu1 %470 }
 0x1a5   :  { %v473_v15 = vpop.xlane.xlu2 %472 }
 0x1ac   :  { %v475_v53 = vpop.xlane.xlu1 %474 }
 0x1ad   :  { %v477_v2 = vpop.xlane.xlu2 %476 }
 0x1ae   :  { %v1532_v45 = vpop.permute.xlu0 %490 }
 0x1af   :  { %v493_v58 = vadd.f32 %v1532_v45, %v423_v18  ;;  %v1572_v62 = vadd.f32 %v1532_v45, %v449_v28  ;;  %v494_v63 = vadd.f32 %v1532_v45, %v425_v20  ;;  %v495_v0 = vadd.f32 %v1532_v45, %v427_v19 }
 0x1b0   :  { %v496_v3 = vadd.f32 %v1532_v45, %v429_v22  ;;  %v497_v4 = vadd.f32 %v1532_v45, %v431_v9  ;;  %v498_v7 = vadd.f32 %v1532_v45, %v433_v24  ;;  %v499_v6 = vadd.f32 %v1532_v45, %v435_v26 }
 0x1b1   :  { %v500_v8 = vadd.f32 %v1532_v45, %v437_v40  ;;  %v501_v5 = vadd.f32 %v1532_v45, %v439_v27  ;;  %v502_v10 = vadd.f32 %v1532_v45, %v441_v30  ;;  %v503_v11 = vadd.f32 %v1532_v45, %v443_v25 }
 0x1b2   :  { %v504_v13 = vadd.f32 %v1532_v45, %v445_v29  ;;  %v1589_v14 = vadd.f32 %v1532_v45, %v447_v32  ;;  %v509_v16 = vadd.f32 %v1532_v45, %v455_v23  ;;  %v564_v17 = vperm.slane %v493_v58, %v1530_v21 }
 0x1b3   :  { %v510_v56 = vadd.f32 %v1532_v45, %v457_v12  ;;  %v511_v18 = vadd.f32 %v1532_v45, %v459_v39  ;;  %v566_v19 = vperm.slane %v494_v63, %v1538_v47  ;;  %v570_v9 = vperm.slane %v495_v0, %v1541_v48 }
 0x1b4   :  { %v512_v20 = vadd.f32 %v1532_v45, %v461_v33  ;;  %v513_v22 = vadd.f32 %v1532_v45, %v463_v38  ;;  %v514_v24 = vadd.f32 %v1532_v45, %v465_v42  ;;  %v515_v25 = vadd.f32 %v1532_v45, %v467_v36  ;;  %v479_v40 = vpop.xlane.xlu1 %478 }
 0x1b5   :  { %v516_v26 = vadd.f32 %v1532_v45, %v469_v41  ;;  %v517_v27 = vadd.f32 %v1532_v45, %v471_v43  ;;  %v568_v28 = vsel %vm567_vm1, %v566_v19, %v564_v17  ;;  %v574_v29 = vperm.slane %v496_v3, %v1544_v51 }
 0x1b6   :  { %v518_v30 = vadd.f32 %v1532_v45, %v473_v15  ;;  %v572_v23 = vsel %vm571_vm2, %v570_v9, %v568_v28  ;;  %v578_v32 = vperm.slane %v497_v4, %v1547_v52  ;;  %v582_v33 = vperm.slane %v498_v7, %v1550_v35 }
 0x1b7   :  { %v576_v12 = vsel %vm575_vm3, %v574_v29, %v572_v23  ;;  %v625_v36 = vperm.slane %v509_v16, %v1530_v21  ;;  %v626_v38 = vperm.slane %v510_v56, %v1538_v47  ;;  %v628_v39 = vperm.slane %v511_v18, %v1541_v48  ;;  %v481_v47 = vpop.xlane.xlu2 %480 }
 0x1b8   :  { %v519_v41 = vadd.f32 %v1532_v45, %v475_v53  ;;  %v520_v42 = vadd.f32 %v1532_v45, %v477_v2  ;;  %v580_v43 = vsel %vm579_vm4, %v578_v32, %v576_v12  ;;  %v586_v15 = vperm.slane %v499_v6, %v1553_v55 }
 0x1b9   :  { %v584_v58 = vsel %vm583_vm5, %v582_v33, %v580_v43  ;;  %v590_v63 = vperm.slane %v500_v8, %v1556_v54  ;;  %v627_v0 = vsel %vm567_vm1, %v626_v38, %v625_v36  ;;  %v630_v3 = vperm.slane %v512_v20, %v1544_v51 }
 0x1ba   :  { %v588_v48 = vsel %vm587_vm6, %v586_v15, %v584_v58  ;;  %v594_v4 = vperm.slane %v501_v5, %v1559_v57  ;;  %v629_v53 = vsel %vm571_vm2, %v628_v39, %v627_v0  ;;  %v632_v2 = vperm.slane %v513_v22, %v1547_v52 }
 0x1bb   :  { %v592_v7 = vsel %vm591_vm7, %v590_v63, %v588_v48  ;;  %v598_v6 = vperm.slane %v502_v10, %v1563_v59  ;;  %v631_v16 = vsel %vm575_vm3, %v630_v3, %v629_v53  ;;  %v634_v8 = vperm.slane %v514_v24, %v1550_v35 }
 0x1bc   :  { %v596_v17 = vsel %vm595_vm8, %v594_v4, %v592_v7  ;;  %v602_v51 = vperm.slane %v503_v11, %v1566_v60  ;;  %v633_v56 = vsel %vm579_vm4, %v632_v2, %v631_v16  ;;  %v636_v5 = vperm.slane %v515_v25, %v1553_v55 }
 0x1bd   :  { %v600_v18 = vsel %vm599_vm9, %v598_v6, %v596_v17  ;;  %v606_v52 = vperm.slane %v504_v13, %v1569_v61  ;;  %v635_v19 = vsel %vm583_vm5, %v634_v8, %v633_v56  ;;  %v638_v10 = vperm.slane %v516_v26, %v1556_v54 }
 0x1be   :  { %v604_v9 = vsel %vm603_vm10, %v602_v51, %v600_v18  ;;  %v610_v35 = vperm.slane %v1589_v14, %v1577_v1  ;;  %v637_v20 = vsel %vm587_vm6, %v636_v5, %v635_v19  ;;  %v640_v11 = vperm.slane %v517_v27, %v1559_v57  ;;  %v483_v27 = vpop.xlane.xlu1 %482 }
 0x1bf   :  { %v614_v55 = vperm.slane %v1572_v62, %v1535_v46  ;;  %v608_v22 = vsel %vm607_vm11, %v606_v52, %v604_v9  ;;  %v639_v13 = vsel %vm591_vm7, %v638_v10, %v637_v20  ;;  %v642_v24 = vperm.slane %v518_v30, %v1563_v59  ;;  %v485_v32 = vpop.xlane.xlu2 %484 }
 0x1c0   :  { %v612_v54 = vsel %vm611_vm12, %v610_v35, %v608_v22  ;;  %v641_v25 = vsel %vm595_vm8, %v640_v11, %v639_v13  ;;  %v644_v26 = vperm.slane %v519_v41, %v1566_v60  ;;  %v521_v14 = vadd.f32 %v1532_v45, %v479_v40 }
 0x1c1   :  { %v643_v28 = vsel %vm599_vm9, %v642_v24, %v641_v25  ;;  %v646_v57 = vperm.slane %v520_v42, %v1569_v61  ;;  %v616_v62 = vsel %vm615_vm13, %v614_v55, %v612_v54  ;;  %v522_v23 = vadd.f32 %v1532_v45, %v481_v47 }
 0x1c2   :  { %v645_v29 = vsel %vm603_vm10, %v644_v26, %v643_v28  ;;  %v648_v30 = vperm.slane %v521_v14, %v1577_v1  ;;  %v523_v60 = vadd.f32 %v1532_v45, %v483_v27  ;;  %v507_v12 = vadd.f32 %v1532_v45, %v1525_v31 }
 0x1c3   :  { %v647_v59 = vsel %vm607_vm11, %v646_v57, %v645_v29  ;;  %v617_v61 = vadd.s32 4294967184, %v1530_v21  ;;  %v650_v36 = vperm.slane %v522_v23, %v1535_v46  ;;  %v524_v38 = vadd.f32 %v1532_v45, %v485_v32 }
 0x1c4   :  { %v649_v33 = vsel %vm611_vm12, %v648_v30, %v647_v59  ;;  %v621_v40 = vadd.s32 4294967176, %v1530_v21  ;;  %v508_v1 = vadd.f32 %v1532_v45, %v1527_v34  ;;  %vm661_vm2 = vcmask 1041408   ;;  %v1175_v30 = vld [vmem:[#allocation3] sm:$0xff] }
 0x1c5   :  { %v652_v39 = vperm.slane %v523_v60, %v617_v61  ;;  %v651_v41 = vsel %vm615_vm13, %v650_v36, %v649_v33  ;;  %v618_v42 = vperm.slane %v507_v12, %v617_v61  ;;  %v1672_v6 = vshrl.u32 %v525_v44, 7  ;;  %v1176_v60 = vld [vmem:[#allocation3 + $0x8] sm:$0xff]  ;;  %v1177_v12 = vld [vmem:[#allocation3 + $0x10] sm:$0xff] }
 0x1c6   :  { %v654_v43 = vperm.slane %v524_v38, %v621_v40  ;;  %v622_v58 = vperm.slane %v508_v1, %v621_v40  ;;  %v1178_v1 = vld [vmem:[#allocation3 + $0x18] sm:$0xff] }
 0x1c7   :  { %v620_v15 = vsel %vm619_vm14, %v618_v42, %v616_v62  ;;  %v653_v31 = vsel %vm619_vm14, %v652_v39, %v651_v41  ;;  %1071 = vset.pattern.permute.xlu2 %v1672_v6  ;;  %v1676_v16 = vadd.s32 64, %v1672_v6  ;;  %v713_v11 = vadd.s32 32, %v1672_v6 }
 0x1c8   :  { %v624_v63 = vsel %vm623_vm15, %v622_v58, %v620_v15  ;;  %v655_v0 = vsel %vm623_vm15, %v654_v43, %v653_v31  ;;  %v707_v55 = vadd.s32 24, %v1672_v6  ;;  %v701_v22 = vadd.s32 16, %v1672_v6  ;;  %v1179_v58 = vld [vmem:[#allocation3 + $0x28] sm:$0xff] }
 0x1c9   :  { %v657_v3 = vsel %vm656_vm0, %v655_v0, %v624_v63  ;;  %1079 = vset.pattern.permute.xlu0 %v1676_v16  ;;  %v743_v24 = vadd.s32 72, %v1672_v6  ;;  %v719_v54 = vadd.s32 40, %v1672_v6  ;;  %v773_v25 = vadd.s32 112, %v1672_v6 }
 0x1ca   :  { %v731_v26 = vadd.s32 56, %v1672_v6  ;;  %v725_v14 = vadd.s32 48, %v1672_v6  ;;  %v749_v28 = vadd.s32 80, %v1672_v6  ;;  %v761_v57 = vadd.s32 96, %v1672_v6 }
 0x1cb   :  { %v755_v27 = vadd.s32 88, %v1672_v6  ;;  %v767_v62 = vadd.s32 104, %v1672_v6 }
 0x1d4   :  { %v530_v46 = vpop.permute.xlu1 %529 }
 0x1d5   :  { %vm531_vm1 = vcmp.ge.s32.totalorder %v1530_v21, %v530_v46  ;;  %v1679_v21 = vadd.s32 8, %v1672_v6 }
 0x1d6   :  { %v659_v47 = vsel %vm531_vm1, -inf, %v657_v3 }
 0x1d7   :  { %v660_v34 = vmul.f32 2.0, %v659_v47  ;;  %1072 = vset.pattern.permute.xlu1 %v1679_v21 }
 0x1d9   :  { %v662_v45 = vsel %vm661_vm2, %v660_v34, -inf }
 0x1da   :  { %663 = vmax.xlane.f32.xlu2 %v662_v45 }
 0x24d   :  { %v664_v48 = vpop.xlane.xlu2 %663 }
 0x24e   :  { %v665_v4 = vsub.f32 %v660_v34, %v664_v48  ;;  %v779_v48 = vadd.s32 120, %v1672_v6 }
 0x250   :  { %v666_v53 = vmul.f32 1.442695, %v665_v4 }
 0x252   :  { %1171 = vpow2.f32 %v666_v53 }
 0x258   :  { %v1172_v2 = vpop.eup %1171 }
 0x259   :  { %v668_v7 = vsel %vm661_vm2, %v1172_v2, 0.0 }
 0x25a   :  { %669 = vadd.xlane.f32.xlu0 %v668_v7 }
 0x2cd   :  { %v670_v8 = vpop.xlane.xlu0 %669 }
 0x2ce   :  { %1173 = vrcp.f32 %v670_v8  ;;  %v682_v5 = vand.u32 2147483648, %v670_v8  ;;  %v680_v18 = vand.u32 2147483647, %v670_v8  ;;  %vm676_vm4 = vweird.f32 %v670_v8 }
 0x2d0   :  { %v683_v19 = vor.u32 1.1754944e-38, %v682_v5  ;;  %vm681_vm6 = vcmp.eq.f32.partialorder %v680_v18, 8.507059e+37  ;;  %v1181_v5 = vld [vmem:[#allocation3 + $0x80] sm:$0xff] }
 0x2d4   :  { %v1174_v17 = vpop.eup %1173 }
 0x2d5   :  { %v672_v51 = vmul.f32 %v1174_v17, %v670_v8  ;;  %vm677_vm3 = vweird.f32 %v1174_v17 }
 0x2d6   :  { %vm678_vm5 = vmor %vm676_vm4, %vm677_vm3 }
 0x2d7   :  { %v673_v56 = vsub.f32 1.0, %v672_v51 }
 0x2d9   :  { %v674_v44 = vmul.f32 %v1174_v17, %v673_v56 }
 0x2db   :  { %v675_v52 = vadd.f32 %v1174_v17, %v674_v44 }
 0x2dd   :  { %v679_v10 = vsel %vm678_vm5, %v1174_v17, %v675_v52  ;;  %v1180_v17 = vld [vmem:[#allocation3 + $0x88] sm:$0xff] }
 0x2de   :  { %v684_v9 = vsel %vm681_vm6, %v683_v19, %v679_v10  ;;  %v1182_v10 = vld [vmem:[#allocation3 + $0x90] sm:$0xff] }
 0x2df   :  { %v685_v35 = vmul.f32 %v1172_v2, %v684_v9 }
 0x2e1   :  { %v1683_v20 = vperm.slane %v685_v35, 0  ;;  %954 = vst [vmem:[#allocation10] sm:$0x3] %v685_v35  ;;  %v1691_v13 = vperm.slane %v685_v35, 1  ;;  %v1183_v35 = vld [vmem:[#allocation3 + $0x98] sm:$0xff] }
 0x2e2   :  { %981 = dma.vmem_to_hbm [thread:$0]  %s977_s13, 32, %s979_s11, [#allocation11]  }
 0x2e3   :  { %739 = vperm.xlu0 %1079, %v1683_v20   ;;  %697 = vperm.xlu1 %1072, %v1683_v20  }
 0x2e4   :  { %691 = vperm.xlu2 %1071, %v1683_v20  }
 0x2eb   :  { %1090 = vset.pattern.permute.xlu0 %v713_v11  ;;  %1074 = vset.pattern.permute.xlu1 %v707_v55 }
 0x2ec   :  { %1073 = vset.pattern.permute.xlu2 %v701_v22 }
 0x2f3   :  { %812 = vperm.xlu0 %1090, %v1691_v13   ;;  %709 = vperm.xlu1 %1074, %v1683_v20  }
 0x2f4   :  { %703 = vperm.xlu2 %1073, %v1683_v20  }
 0x2fb   :  { %1095 = vset.pattern.permute.xlu0 %v743_v24  ;;  %1076 = vset.pattern.permute.xlu1 %v719_v54 }
 0x2fc   :  { %1075 = vset.pattern.permute.xlu2 %v713_v11 }
 0x303   :  { %842 = vperm.xlu0 %1095, %v1691_v13   ;;  %721 = vperm.xlu1 %1076, %v1683_v20  }
 0x304   :  { %715 = vperm.xlu2 %1075, %v1683_v20  }
 0x30b   :  { %1100 = vset.pattern.permute.xlu0 %v773_v25  ;;  %1078 = vset.pattern.permute.xlu1 %v731_v26 }
 0x30c   :  { %1077 = vset.pattern.permute.xlu2 %v725_v14 }
 0x313   :  { %872 = vperm.xlu0 %1100, %v1691_v13   ;;  %733 = vperm.xlu1 %1078, %v1683_v20  }
 0x314   :  { %727 = vperm.xlu2 %1077, %v1683_v20  }
 0x31b   :  { %1081 = vset.pattern.permute.xlu1 %v749_v28  ;;  %1103 = vset.pattern.permute.xlu0 %v779_v48 }
 0x31c   :  { %1080 = vset.pattern.permute.xlu2 %v743_v24  ;;  %v1184_v24 = vld [vmem:[#allocation3 + $0xa0] sm:$0xff] }
 0x323   :  { %751 = vperm.xlu1 %1081, %v1683_v20  }
 0x324   :  { %745 = vperm.xlu2 %1080, %v1683_v20  }
 0x32b   :  { %1083 = vset.pattern.permute.xlu1 %v761_v57 }
 0x32c   :  { %1082 = vset.pattern.permute.xlu2 %v755_v27 }
 0x333   :  { %763 = vperm.xlu1 %1083, %v1683_v20  }
 0x334   :  { %757 = vperm.xlu2 %1082, %v1683_v20  }
 0x33b   :  { %1085 = vset.pattern.permute.xlu1 %v773_v25 }
 0x33c   :  { %1084 = vset.pattern.permute.xlu2 %v767_v62 }
 0x33e   :  { %v692_v29 = vpop.permute.xlu2 %691 }
 0x33f   :  { %v880_v32 = vmul.f32 %v1175_v30, %v692_v29  ;;  %v1187_v29 = vld [vmem:[#allocation3 + $0xb0] sm:$0xff] }
 0x343   :  { %775 = vperm.xlu1 %1085, %v1683_v20  }
 0x344   :  { %769 = vperm.xlu2 %1084, %v1683_v20  }
 0x34b   :  { %1087 = vset.pattern.permute.xlu1 %v1679_v21 }
 0x34c   :  { %1086 = vset.pattern.permute.xlu2 %v1672_v6 }
 0x34e   :  { %v704_v23 = vpop.permute.xlu2 %703 }
 0x34f   :  { %v882_v61 = vmul.f32 %v1177_v12, %v704_v23 }
 0x353   :  { %794 = vperm.xlu1 %1087, %v1691_v13  }
 0x354   :  { %788 = vperm.xlu2 %1086, %v1691_v13  }
 0x355   :  { %v698_v59 = vpop.permute.xlu1 %697  ;;  %v740_v56 = vpop.permute.xlu0 %739 }
 0x356   :  { %v881_v33 = vmul.f32 %v1176_v60, %v698_v59  ;;  %v1188_v59 = vld [vmem:[#allocation3 + $0x48] sm:$0xff] }
 0x358   :  { %v912_v36 = vadd.f32 %v881_v33, %v880_v32  ;;  %v1189_v32 = vld [vmem:[#allocation3 + $0x50] sm:$0xff] }
 0x35a   :  { %v913_v38 = vadd.f32 %v912_v36, %v882_v61 }
 0x35b   :  { %1089 = vset.pattern.permute.xlu1 %v707_v55 }
 0x35c   :  { %1088 = vset.pattern.permute.xlu2 %v701_v22 }
 0x35e   :  { %v716_v39 = vpop.permute.xlu2 %715 }
 0x35f   :  { %v884_v42 = vmul.f32 %v716_v39, %v1404_v37 }
 0x363   :  { %806 = vperm.xlu1 %1089, %v1691_v13  }
 0x364   :  { %800 = vperm.xlu2 %1088, %v1691_v13  }
 0x365   :  { %v710_v40 = vpop.permute.xlu1 %709  ;;  %v813_v55 = vpop.permute.xlu0 %812 }
 0x366   :  { %v883_v41 = vmul.f32 %v1178_v1, %v710_v40  ;;  %v1190_v40 = vld [vmem:[#allocation3 + $0xb8] sm:$0xff] }
 0x368   :  { %v914_v43 = vadd.f32 %v913_v38, %v883_v41  ;;  %v1191_v41 = vld [vmem:[#allocation3 + $0xc0] sm:$0xff] }
 0x36a   :  { %v915_v15 = vadd.f32 %v914_v43, %v884_v42  ;;  %v1192_v43 = vld [vmem:[#allocation3 + $0x58] sm:$0xff] }
 0x36b   :  { %1092 = vset.pattern.permute.xlu1 %v725_v14 }
 0x36c   :  { %1091 = vset.pattern.permute.xlu2 %v719_v54  ;;  %v900_v54 = vmul.f32 %v1184_v24, %v813_v55 }
 0x36e   :  { %v728_v46 = vpop.permute.xlu2 %727 }
 0x36f   :  { %v886_v37 = vmul.f32 %v728_v46, %v1407_v49 }
 0x373   :  { %824 = vperm.xlu1 %1092, %v1691_v13  }
 0x374   :  { %818 = vperm.xlu2 %1091, %v1691_v13  }
 0x375   :  { %v722_v31 = vpop.permute.xlu1 %721 }
 0x376   :  { %v885_v63 = vmul.f32 %v1179_v58, %v722_v31  ;;  %v1193_v31 = vld [vmem:[#allocation3 + $0x60] sm:$0xff] }
 0x378   :  { %v916_v0 = vadd.f32 %v915_v15, %v885_v63 }
 0x37a   :  { %v917_v34 = vadd.f32 %v916_v0, %v886_v37  ;;  %v843_v0 = vpop.permute.xlu0 %842 }
 0x37b   :  { %1094 = vset.pattern.permute.xlu1 %v1676_v16 }
 0x37c   :  { %1093 = vset.pattern.permute.xlu2 %v731_v26  ;;  %v1185_v26 = vld [vmem:[#allocation3 + $0x40] sm:$0xff] }
 0x37d   :  { %v888_v14 = vmul.f32 %v1185_v26, %v740_v56  ;;  %v1203_v26 = vld [vmem:[#allocation3 + $0xf8] sm:$0xff] }
 0x37e   :  { %v746_v49 = vpop.permute.xlu2 %745 }
 0x37f   :  { %v889_v30 = vmul.f32 %v1188_v59, %v746_v49  ;;  %v1195_v49 = vld [vmem:[#allocation3 + $0x68] sm:$0xff] }
 0x383   :  { %836 = vperm.xlu1 %1094, %v1691_v13  }
 0x384   :  { %830 = vperm.xlu2 %1093, %v1691_v13  }
 0x385   :  { %v734_v3 = vpop.permute.xlu1 %733 }
 0x386   :  { %v887_v47 = vmul.f32 %v734_v3, %v1409_v50 }
 0x388   :  { %v918_v45 = vadd.f32 %v917_v34, %v887_v47  ;;  %v1194_v47 = vld [vmem:[#allocation3 + $0xc8] sm:$0xff] }
 0x389   :  { %v905_v34 = vmul.f32 %v1194_v47, %v843_v0 }
 0x38b   :  { %1097 = vset.pattern.permute.xlu1 %v755_v27  ;;  %v1186_v27 = vld [vmem:[#allocation3 + $0xa8] sm:$0xff] }
 0x38c   :  { %1096 = vset.pattern.permute.xlu2 %v749_v28 }
 0x38e   :  { %v758_v50 = vpop.permute.xlu2 %757 }
 0x38f   :  { %v891_v15 = vmul.f32 %v1192_v43, %v758_v50  ;;  %v1198_v50 = vld [vmem:[#allocation3 + $0xd8] sm:$0xff] }
 0x393   :  { %854 = vperm.xlu1 %1097, %v1691_v13  }
 0x394   :  { %848 = vperm.xlu2 %1096, %v1691_v13  }
 0x395   :  { %v752_v4 = vpop.permute.xlu1 %751 }
 0x396   :  { %v890_v60 = vmul.f32 %v1189_v32, %v752_v4 }
 0x39b   :  { %1099 = vset.pattern.permute.xlu1 %v767_v62 }
 0x39c   :  { %1098 = vset.pattern.permute.xlu2 %v761_v57  ;;  %v919_v57 = vadd.f32 %v918_v45, %v888_v14 }
 0x39e   :  { %v770_v53 = vpop.permute.xlu2 %769  ;;  %v920_v61 = vadd.f32 %v919_v57, %v889_v30 }
 0x39f   :  { %v893_v4 = vmul.f32 %v1195_v49, %v770_v53 }
 0x3a0   :  { %v921_v39 = vadd.f32 %v920_v61, %v890_v60 }
 0x3a2   :  { %v922_v46 = vadd.f32 %v921_v39, %v891_v15 }
 0x3a3   :  { %866 = vperm.xlu1 %1099, %v1691_v13  }
 0x3a4   :  { %860 = vperm.xlu2 %1098, %v1691_v13  }
 0x3a5   :  { %v764_v2 = vpop.permute.xlu1 %763 }
 0x3a6   :  { %v892_v58 = vmul.f32 %v1193_v31, %v764_v2  ;;  %v1199_v2 = vld [vmem:[#allocation3 + $0x78] sm:$0xff] }
 0x3a8   :  { %v923_v45 = vadd.f32 %v922_v46, %v892_v58 }
 0x3ab   :  { %1102 = vset.pattern.permute.xlu1 %v779_v48 }
 0x3ac   :  { %1101 = vset.pattern.permute.xlu2 %v779_v48 }
 0x3ae   :  { %v789_v7 = vpop.permute.xlu2 %788 }
 0x3af   :  { %v896_v44 = vmul.f32 %v1181_v5, %v789_v7  ;;  %v1196_v7 = vld [vmem:[#allocation3 + $0x70] sm:$0xff] }
 0x3b3   :  { %878 = vperm.xlu1 %1102, %v1691_v13  }
 0x3b4   :  { %781 = vperm.xlu2 %1101, %v1683_v20  }
 0x3b5   :  { %v776_v6 = vpop.permute.xlu1 %775 }
 0x3be   :  { %v801_v16 = vpop.permute.xlu2 %800 }
 0x3bf   :  { %v898_v9 = vmul.f32 %v1182_v10, %v801_v16  ;;  %v894_v16 = vmul.f32 %v1196_v7, %v776_v6  ;;  %v873_v6 = vpop.permute.xlu0 %872 }
 0x3c5   :  { %v795_v21 = vpop.permute.xlu1 %794 }
 0x3c6   :  { %v897_v51 = vmul.f32 %v1180_v17, %v795_v21  ;;  %v1197_v17 = vld [vmem:[#allocation3 + $0xd0] sm:$0xff] }
 0x3c8   :  { %v933_v52 = vadd.f32 %v897_v51, %v896_v44 }
 0x3ca   :  { %v934_v11 = vadd.f32 %v933_v52, %v898_v9  ;;  %v1200_v9 = vld [vmem:[#allocation3 + $0xe0] sm:$0xff] }
 0x3ce   :  { %v819_v8 = vpop.permute.xlu2 %818 }
 0x3cf   :  { %v901_v62 = vmul.f32 %v1186_v27, %v819_v8  ;;  %v924_v8 = vadd.f32 %v923_v45, %v893_v4 }
 0x3d1   :  { %v925_v44 = vadd.f32 %v924_v8, %v894_v16 }
 0x3d5   :  { %v807_v18 = vpop.permute.xlu1 %806 }
 0x3d6   :  { %v899_v20 = vmul.f32 %v1183_v35, %v807_v18 }
 0x3d8   :  { %v935_v22 = vadd.f32 %v934_v11, %v899_v20  ;;  %v1201_v20 = vld [vmem:[#allocation3 + $0xe8] sm:$0xff] }
 0x3da   :  { %v936_v28 = vadd.f32 %v935_v22, %v900_v54 }
 0x3dc   :  { %v937_v33 = vadd.f32 %v936_v28, %v901_v62 }
 0x3de   :  { %v831_v19 = vpop.permute.xlu2 %830 }
 0x3df   :  { %v903_v1 = vmul.f32 %v1190_v40, %v831_v19 }
 0x3e5   :  { %v825_v13 = vpop.permute.xlu1 %824 }
 0x3e6   :  { %v902_v23 = vmul.f32 %v1187_v29, %v825_v13  ;;  %v1202_v13 = vld [vmem:[#allocation3 + $0xf0] sm:$0xff] }
 0x3e7   :  { %v910_v24 = vmul.f32 %v1202_v13, %v873_v6 }
 0x3e8   :  { %v938_v36 = vadd.f32 %v937_v33, %v902_v23 }
 0x3ea   :  { %v939_v63 = vadd.f32 %v938_v36, %v903_v1 }
 0x3ee   :  { %v849_v25 = vpop.permute.xlu2 %848 }
 0x3ef   :  { %v906_v51 = vmul.f32 %v1197_v17, %v849_v25 }
 0x3f5   :  { %v837_v12 = vpop.permute.xlu1 %836 }
 0x3f6   :  { %v904_v42 = vmul.f32 %v1191_v41, %v837_v12 }
 0x3f8   :  { %v940_v37 = vadd.f32 %v939_v63, %v904_v42 }
 0x3fa   :  { %v941_v21 = vadd.f32 %v940_v37, %v905_v34 }
 0x3fc   :  { %v942_v18 = vadd.f32 %v941_v21, %v906_v51 }
 0x3fe   :  { %v861_v38 = vpop.permute.xlu2 %860 }
 0x3ff   :  { %v908_v35 = vmul.f32 %v1200_v9, %v861_v38 }
 0x405   :  { %v855_v3 = vpop.permute.xlu1 %854 }
 0x406   :  { %v907_v56 = vmul.f32 %v1198_v50, %v855_v3 }
 0x408   :  { %v943_v19 = vadd.f32 %v942_v18, %v907_v56 }
 0x40a   :  { %v944_v55 = vadd.f32 %v943_v19, %v908_v35 }
 0x40e   :  { %v782_v48 = vpop.permute.xlu2 %781 }
 0x40f   :  { %v895_v5 = vmul.f32 %v1199_v2, %v782_v48 }
 0x411   :  { %v926_v10 = vadd.f32 %v925_v44, %v895_v5 }
 0x413   :  { %v927_v53 = vrot.slane %v926_v10, 4 }
 0x415   :  { %v867_v52 = vpop.permute.xlu1 %866  ;;  %v928_v54 = vadd.f32 %v927_v53, %v926_v10 }
 0x416   :  { %v909_v11 = vmul.f32 %v1201_v20, %v867_v52 }
 0x417   :  { %v929_v57 = vrot.slane %v928_v54, 2 }
 0x418   :  { %v945_v22 = vadd.f32 %v944_v55, %v909_v11 }
 0x419   :  { %v930_v29 = vadd.f32 %v929_v57, %v928_v54 }
 0x41a   :  { %v946_v28 = vadd.f32 %v945_v22, %v910_v24 }
 0x41b   :  { %v931_v30 = vrot.slane %v930_v29, 1 }
 0x41d   :  { %v932_v33 = vadd.f32 %v931_v30, %v930_v29 }
 0x425   :  { %v879_v25 = vpop.permute.xlu1 %878 }
 0x426   :  { %v911_v14 = vmul.f32 %v1203_v26, %v879_v25 }
 0x428   :  { %v947_v27 = vadd.f32 %v946_v28, %v911_v14 }
 0x42a   :  { %v948_v62 = vrot.slane %v947_v27, 4 }
 0x42c   :  { %v949_v23 = vadd.f32 %v948_v62, %v947_v27 }
 0x42e   :  { %v950_v59 = vrot.slane %v949_v23, 2 }
 0x430   :  { %v951_v32 = vadd.f32 %v950_v59, %v949_v23 }
 0x432   :  { %v952_v60 = vrot.slane %v951_v32, 1 }
 0x434   :  { %v953_v12 = vadd.f32 %v952_v60, %v951_v32 }
 0x436   :  { %v957_v61 = vsel %vm656_vm0, %v953_v12, %v932_v33 }
 0x437   :  { %959 = vst [vmem:[#allocation9] sm:$0x3] %v957_v61 }
 0x438   :  { %970 = dma.vmem_to_hbm [thread:$0]  %s966_s14, 32, %s968_s17, [#allocation5]  }
 0x439   :  { %1328 = dma.done.wait [#allocation5], 32  }
 0x43a   :  { %1329 = vsyncadd [#allocation5], 4294967264 }
 0x43b   :  { %1330 = dma.done.wait [#allocation11], 32  }
 0x43c   :  { %1331 = vsyncadd [#allocation11], 4294967264 }
 0x43d   :  { %990 = vsyncpa [#allocation4], 1 }
 0x43e   :  { %991 = vsyncpa [#allocation7], 1 }
 0x43f   :  { %992 = vsyncpa [#allocation5], 1 }
 0x440   :  { %993 = vsyncpa [#allocation11], 1 }

</bundles_post_ra>
